<compile_context>
chip_gen: v7x
topology: tpu7x:2x2x1
jax: 0.10.0
libtpu: 0.0.40
codegen_flags: <defaults>
</compile_context>

<pallas_src>
import jax
import jax.numpy as jnp
from jax.experimental import pallas as pl
from jax.experimental.pallas import tpu as pltpu


def _attention_kernel(x_ref, u_ref, wfc_ref, bfc_ref, bbil_ref, o_ref):
    """One grid step = one tile of Bt batch elements.

    Block shapes:
      x_ref    (Bt, S, Hp)  lstm_output tile (padded hidden dim)
      u_ref    (Bt, 1, Hp)  precomputed W_bil @ fc(hidden) per batch
      wfc_ref  (Hp, Hp)     fc weight, pre-transposed so y = x @ wfc + b
      bfc_ref  (1, Hp)      fc bias (zero-padded)
      bbil_ref (1, 1)       bilinear bias scalar, in SMEM
      o_ref    (Bt, Hp)     attention output tile
    """
    Bt, S, Hp = x_ref.shape

    # Shared Linear layer over the whole tile: one big MXU matmul per grid step.
    x = x_ref[...].reshape(Bt * S, Hp)
    y = jnp.dot(x, wfc_ref[...], preferred_element_type=jnp.float32) + bfc_ref[...]
    y = y.reshape(Bt, S, Hp)                                   # fc(lstm_output), f32

    # Bilinear(H, H, 1): score[b, s] = y[b, s] . u[b] + b_bil   (VPU mul + XLU lane-reduce)
    u = u_ref[...]                                             # (Bt, 1, Hp), f32
    scores = jnp.sum(y * u, axis=-1) + bbil_ref[0, 0]          # (Bt, S)

    # softmax over the sequence axis (max-stabilized).
    m = jnp.max(scores, axis=-1, keepdims=True)
    e = jnp.exp(scores - m)
    denom = jnp.sum(e, axis=-1, keepdims=True)
    attn = e * pl.reciprocal(denom, approx=True)               # EUP reciprocal, (Bt, S)

    # attention_output[b] = sum_s attn[b, s] * y[b, s]          (VPU mul + XLU sublane-reduce)
    out = jnp.sum(attn[:, :, None] * y, axis=1)                # (Bt, Hp)
    o_ref[...] = out.astype(o_ref.dtype)


def _pad_to(x, shape):
    pads = [(0, t - s) for s, t in zip(x.shape, shape)]
    return jnp.pad(x, pads) if any(p[1] for p in pads) else x


def attention_forward(lstm_output, lstm_hidden, params, *, batch_tile=None,
                      mxu_dtype=jnp.float32):
    """Pallas wrapper.  lstm_output (B,S,H), lstm_hidden (1,B,H) -> (B,H)."""
    B, S, H = lstm_output.shape
    f32 = jnp.float32
    Hp = ((H + 127) // 128) * 128            # lane-dense: pad hidden dim to 128 multiple

    # ---- hoisted, batched precompute (two (B,H)@(H,H) matmuls, plain XLA) ----
    w_fc_t = params["w_fc"].T.astype(f32)                      # (H, H): y = x @ w_fc_t + b
    b_fc = params["b_fc"].astype(f32)                          # (H,)
    w_bil = params["w_bil"].reshape(H, H).astype(f32)          # (H, H)
    h = jnp.squeeze(lstm_hidden, axis=0).astype(f32)           # (B, H)
    hq = h @ w_fc_t + b_fc                                     # fc(hidden)        (B, H)
    u = hq @ w_bil.T                                           # W_bil @ hq  per b (B, H)

    # ---- batch tiling: flatten ~512 MXU rows per grid step ----
    if batch_tile is None:
        batch_tile = max(1, min(B, 512 // max(S, 1)))
    Bt = min(batch_tile, B)
    if Bt < B:
        Bt = ((Bt + 7) // 8) * 8             # sublane-aligned output tile when tiling batch
    Bp = ((B + Bt - 1) // Bt) * Bt           # pad batch to a tile multiple
    Bt = min(Bt, Bp)

    # ---- one-time wrapper-side padding (zeros keep the math exact) ----
    x_p = _pad_to(lstm_output.astype(mxu_dtype), (Bp, S, Hp))
    u_p = _pad_to(u.reshape(B, 1, H), (Bp, 1, Hp))
    wfc_p = _pad_to(w_fc_t.astype(mxu_dtype), (Hp, Hp))
    bfc_p = _pad_to(b_fc.reshape(1, H), (1, Hp))
    bbil = params["b_bil"].reshape(1, 1).astype(f32)

    out = pl.pallas_call(
        _attention_kernel,
        out_shape=jax.ShapeDtypeStruct((Bp, Hp), f32),
        grid_spec=pltpu.PrefetchScalarGridSpec(
            num_scalar_prefetch=0,
            grid=(Bp // Bt,),
            in_specs=[
                pl.BlockSpec((Bt, S, Hp), lambda b: (b, 0, 0)),     # lstm_output tile
                pl.BlockSpec((Bt, 1, Hp), lambda b: (b, 0, 0)),     # u = W_bil @ fc(hidden)
                pl.BlockSpec((Hp, Hp), lambda b: (0, 0)),           # fc weight (transposed)
                pl.BlockSpec((1, Hp), lambda b: (0, 0)),            # fc bias
                pl.BlockSpec(memory_space=pltpu.MemorySpace.SMEM),  # bilinear bias scalar
            ],
            out_specs=pl.BlockSpec((Bt, Hp), lambda b: (b, 0)),
        ),
        compiler_params=pltpu.CompilerParams(dimension_semantics=("parallel",)),
    )(x_p, u_p, wfc_p, bfc_p, bbil)
    return out[:B, :H]


def attention_ref(lstm_output, lstm_hidden, params):
    """Pure-JAX reference for correctness checking."""
    h = jnp.squeeze(lstm_hidden, axis=0)                      # (B, H)
    fc = lambda z: z @ params["w_fc"].T + params["b_fc"]
    hq = fc(h)                                                # (B, H)
    y = fc(lstm_output)                                       # (B, S, H)
    w = params["w_bil"][0]                                    # (H, H)
    scores = jnp.einsum("bsi,ij,bj->bs", y, w, hq) + params["b_bil"][0]
    attn = jax.nn.softmax(scores, axis=1)                     # (B, S)
    return jnp.einsum("bsh,bs->bh", y, attn)                  # (B, H)


def init_params(key, hidden_size):
    k1, k2, k3, k4 = jax.random.split(key, 4)
    bound = 1.0 / jnp.sqrt(hidden_size)
    return {
        "w_fc": jax.random.uniform(k1, (hidden_size, hidden_size), jnp.float32, -bound, bound),
        "b_fc": jax.random.uniform(k2, (hidden_size,), jnp.float32, -bound, bound),
        "w_bil": jax.random.uniform(k3, (1, hidden_size, hidden_size), jnp.float32, -bound, bound),
        "b_bil": jax.random.uniform(k4, (1,), jnp.float32, -bound, bound),
    }


if __name__ == "__main__":
    B, S, H = 2, 8, 32
    key = jax.random.PRNGKey(0)
    kp, kx, kh = jax.random.split(key, 3)

    params = init_params(kp, H)
    lstm_output = jax.random.normal(kx, (B, S, H), jnp.float32)
    lstm_hidden = jax.random.normal(kh, (1, B, H), jnp.float32)

    out = attention_forward(lstm_output, lstm_hidden, params)
    out = jax.block_until_ready(out)

    ref = attention_ref(lstm_output, lstm_hidden, params)
    assert out.shape == (B, H)
    # Tolerance accounts for the approximate EUP reciprocal in the softmax
    # normalization; structural/indexing bugs would produce errors >> 1e-2.
    assert jnp.allclose(out, ref, atol=1e-2, rtol=1e-2), (out, ref)

    print("KERNEL_OK")
</pallas_src>

<mosaic_0001>
module attributes {stable_mosaic.version = 11 : i64} {
  func.func @_attention_kernel(%arg0: i32, %arg1: memref<2x8x128xf32, #tpu.memory_space<vmem>>, %arg2: memref<2x1x128xf32, #tpu.memory_space<vmem>>, %arg3: memref<128x128xf32, #tpu.memory_space<vmem>>, %arg4: memref<1x128xf32, #tpu.memory_space<vmem>>, %arg5: memref<1x1xf32, #tpu.memory_space<smem>>, %arg6: memref<2x128xf32, #tpu.memory_space<vmem>>) attributes {dimension_semantics = [#tpu.dimension_semantics<parallel>], iteration_bounds = array<i64: 1>, scalar_prefetch = 0 : i64, scratch_operands = 0 : i64, tpu.core_type = #tpu.core_type<tc>, window_params = [{transform_indices = @transform_0, window_bounds = array<i64: 2, 8, 128>}, {transform_indices = @transform_1, window_bounds = array<i64: 2, 1, 128>}, {pipeline_mode = #tpu.pipeline_mode<synchronous>, transform_indices = @transform_2, window_bounds = array<i64: 128, 128>}, {pipeline_mode = #tpu.pipeline_mode<synchronous>, transform_indices = @transform_3, window_bounds = array<i64: 1, 128>}, {transform_indices = @transform_4, window_bounds = array<i64: 1, 1>}, {transform_indices = @transform_5, window_bounds = array<i64: 2, 128>}]} {
    %c0 = arith.constant 0 : index
    %c0_0 = arith.constant 0 : index
    %c0_1 = arith.constant 0 : index
    %0 = vector.load %arg1[%c0, %c0_0, %c0_1] : memref<2x8x128xf32, #tpu.memory_space<vmem>>, vector<2x8x128xf32>
    %1 = vector.shape_cast %0 : vector<2x8x128xf32> to vector<16x128xf32>
    %c0_2 = arith.constant 0 : index
    %c0_3 = arith.constant 0 : index
    %2 = vector.load %arg3[%c0_2, %c0_3] : memref<128x128xf32, #tpu.memory_space<vmem>>, vector<128x128xf32>
    %cst = arith.constant dense<0.000000e+00> : vector<16x128xf32>
    %3 = tpu.matmul %1, %2, %cst {dimension_numbers = #tpu.dot_dimension_numbers<[1], [0], [0], [1], [0, 0, 1, 1], [], []>} : vector<16x128xf32>, vector<128x128xf32>, vector<16x128xf32> -> vector<16x128xf32>
    %c0_4 = arith.constant 0 : index
    %c0_5 = arith.constant 0 : index
    %4 = vector.load %arg4[%c0_4, %c0_5] : memref<1x128xf32, #tpu.memory_space<vmem>>, vector<1x128xf32>
    %5 = vector.broadcast %4 : vector<1x128xf32> to vector<16x128xf32>
    %6 = arith.addf %3, %5 : vector<16x128xf32>
    %7 = vector.shape_cast %6 : vector<16x128xf32> to vector<2x8x128xf32>
    %c0_6 = arith.constant 0 : index
    %c0_7 = arith.constant 0 : index
    %c0_8 = arith.constant 0 : index
    %8 = vector.load %arg2[%c0_6, %c0_7, %c0_8] : memref<2x1x128xf32, #tpu.memory_space<vmem>>, vector<2x1x128xf32>
    %9 = vector.broadcast %8 : vector<2x1x128xf32> to vector<2x8x128xf32>
    %10 = arith.mulf %7, %9 : vector<2x8x128xf32>
    %cst_9 = arith.constant dense<0.000000e+00> : vector<2x8xf32>
    %11 = vector.multi_reduction <add>, %10, %cst_9 [2] : vector<2x8x128xf32> to vector<2x8xf32>
    %c0_10 = arith.constant 0 : index
    %c0_11 = arith.constant 0 : index
    %12 = memref.load %arg5[%c0_10, %c0_11] : memref<1x1xf32, #tpu.memory_space<smem>>
    %13 = vector.broadcast %12 : f32 to vector<2x8xf32>
    %14 = arith.addf %11, %13 : vector<2x8xf32>
    %cst_12 = arith.constant dense<0xFF800000> : vector<2xf32>
    %15 = vector.multi_reduction <maximumf>, %14, %cst_12 [1] : vector<2x8xf32> to vector<2xf32>
    %16 = vector.shape_cast %15 : vector<2xf32> to vector<2x1xf32>
    %17 = vector.broadcast %16 : vector<2x1xf32> to vector<2x8xf32>
    %18 = arith.subf %14, %17 : vector<2x8xf32>
    %19 = math.exp %18 : vector<2x8xf32>
    %cst_13 = arith.constant dense<0.000000e+00> : vector<2xf32>
    %20 = vector.multi_reduction <add>, %19, %cst_13 [1] : vector<2x8xf32> to vector<2xf32>
    %21 = vector.shape_cast %20 : vector<2xf32> to vector<2x1xf32>
    %22 = tpu.reciprocal %21 {approx = true} : vector<2x1xf32> -> vector<2x1xf32>
    %23 = vector.broadcast %22 : vector<2x1xf32> to vector<2x8xf32>
    %24 = arith.mulf %19, %23 : vector<2x8xf32>
    %25 = vector.shape_cast %24 : vector<2x8xf32> to vector<2x8x1xf32>
    %26 = vector.broadcast %25 : vector<2x8x1xf32> to vector<2x8x128xf32>
    %27 = arith.mulf %26, %7 : vector<2x8x128xf32>
    %cst_14 = arith.constant dense<0.000000e+00> : vector<2x128xf32>
    %28 = vector.multi_reduction <add>, %27, %cst_14 [1] : vector<2x8x128xf32> to vector<2x128xf32>
    %c0_15 = arith.constant 0 : index
    %c0_16 = arith.constant 0 : index
    %29 = vector.load %arg6[%c0_15, %c0_16] : memref<2x128xf32, #tpu.memory_space<vmem>>, vector<2x128xf32>
    tpu.vector_store %arg6[%c0_15, %c0_16], %28 {strides = array<i32>} : memref<2x128xf32, #tpu.memory_space<vmem>>, vector<2x128xf32>,
    return
  }
  func.func @transform_0(%arg0: i32) -> (i32, i32, i32) {
    %c0_i32 = arith.constant 0 : i32
    %c0_i32_0 = arith.constant 0 : i32
    %c0_i32_1 = arith.constant 0 : i32
    return %arg0, %c0_i32, %c0_i32_0 : i32, i32, i32
  }
  func.func @transform_1(%arg0: i32) -> (i32, i32, i32) {
    %c0_i32 = arith.constant 0 : i32
    %c0_i32_0 = arith.constant 0 : i32
    %c0_i32_1 = arith.constant 0 : i32
    return %arg0, %c0_i32, %c0_i32_0 : i32, i32, i32
  }
  func.func @transform_2(%arg0: i32) -> (i32, i32) {
    %c0_i32 = arith.constant 0 : i32
    %c0_i32_0 = arith.constant 0 : i32
    %c0_i32_1 = arith.constant 0 : i32
    return %c0_i32, %c0_i32_0 : i32, i32
  }
  func.func @transform_3(%arg0: i32) -> (i32, i32) {
    %c0_i32 = arith.constant 0 : i32
    %c0_i32_0 = arith.constant 0 : i32
    %c0_i32_1 = arith.constant 0 : i32
    return %c0_i32, %c0_i32_0 : i32, i32
  }
  func.func @transform_4(%arg0: i32) -> (i32, i32) {
    %c0_i32 = arith.constant 0 : i32
    %c0_i32_0 = arith.constant 0 : i32
    %c0_i32_1 = arith.constant 0 : i32
    return %c0_i32, %c0_i32_0 : i32, i32
  }
  func.func @transform_5(%arg0: i32) -> (i32, i32) {
    %c0_i32 = arith.constant 0 : i32
    %c0_i32_0 = arith.constant 0 : i32
    return %arg0, %c0_i32 : i32, i32
  }
}

</mosaic_0001>

<bundles_post_ra>
// kernel: tpu_custom_call.1
= control target key start
LH: loop header
LB: loop body
LE: loop exit
PB: predicated region body
PF: predicated region fallthrough
CT: control target
= control target key end

     0   :  { %11 = vsyncpa [#allocation4], 0  ;;  %s553_s0 = inlined_call_operand.hbm [shape: f32[2,8,128], index: 0, kind: input, shape index: {}]   ;;  %s554_s1 = inlined_call_operand.vmem [shape: f32[2,1,128], index: 1, kind: input, shape index: {}]   ;;  %s555_s2 = inlined_call_operand.hbm [shape: f32[128,128], index: 2, kind: input, shape index: {}]   ;;  %s556_s3 = inlined_call_operand.vmem [shape: f32[1,128], index: 3, kind: input, shape index: {}]   ;;  %s557_s4 = inlined_call_operand.<no memory space> [shape: f32[1,1], index: 4, kind: input, shape index: {}]   ;;  %s558_s5 = inlined_call_operand.hbm [shape: f32[2,128], index: 5, kind: output, shape index: {}]  }
   0x1   :  { %12 = vsyncpa [#allocation7], 0 }
   0x2   :  { %13 = vsyncpa [#allocation5], 0  ;;  %s464_s18 = smov [#allocation3]   ;;  %s392_s22 = scalar_lea.hbm %s553_s0, 256 }
   0x3   :  { %s19_s19 = sshll.u32 %s464_s18, 4  ;;  %p393_p0 = scmp.ne.s32.totalorder %s553_s0, %s392_s22  ;;  %s20_s19 = int_to_ptr.vmem [resolvable:$true] %s19_s19 }
   0x4   :  { %p396_p1 = scmp.lt.u32.totalorder %s392_s22, %s553_s0 }
   0x6   :  { %p398_p2 = pnand %p396_p1, %p393_p0 }
   0x8   :  { %401 = shalt.err (!%p398_p2)
}
   0x9   :  { %s402_s27 = scalar_lea.vmem %s20_s19, 256  ;;  %p407_p4 = scmp.lt.s32.totalorder %s20_s19, %s20_s19 }
   0xa   :  { %p403_p3 = scmp.ne.s32.totalorder %s20_s19, %s402_s27  ;;  %p408_p5 = scmp.lt.s32.totalorder %s402_s27, %s402_s27 }
   0xc   :  { %p409_p6 = por %p408_p5, %p407_p4 }
   0xe   :  { %p410_p7 = pnand %p409_p6, %p403_p3 }
  0x10   :  { %413 = shalt.err (!%p410_p7)
}
  0x11   :  { %s465_s28 = smov 128   ;;  %s466_s29 = smov 8  }
  0x12   :  { %25 = dma.hbm_to_vmem [thread:$0]  %s553_s0, 256, %s20_s19, [#allocation4], %s465_s28, %s465_s28, %s466_s29  }
  0x13   :  { %s467_s7 = smov [#allocation6]   ;;  %s414_s11 = scalar_lea.hbm %s555_s2, 2048 }
  0x14   :  { %s33_s8 = sshll.u32 %s467_s7, 4  ;;  %p415_p8 = scmp.ne.s32.totalorder %s555_s2, %s414_s11  ;;  %s34_s8 = int_to_ptr.vmem [resolvable:$true] %s33_s8 }
  0x15   :  { %p418_p9 = scmp.lt.u32.totalorder %s414_s11, %s555_s2 }
  0x17   :  { %p420_p10 = pnand %p418_p9, %p415_p8 }
  0x19   :  { %423 = shalt.err (!%p420_p10)
}
  0x1a   :  { %s424_s16 = scalar_lea.vmem %s34_s8, 2048  ;;  %p429_p12 = scmp.lt.s32.totalorder %s34_s8, %s34_s8 }
  0x1b   :  { %p425_p11 = scmp.ne.s32.totalorder %s34_s8, %s424_s16  ;;  %p430_p13 = scmp.lt.s32.totalorder %s424_s16, %s424_s16 }
  0x1d   :  { %p431_p0 = por %p430_p13, %p429_p12 }
  0x1f   :  { %p432_p1 = pnand %p431_p0, %p425_p11 }
  0x21   :  { %435 = shalt.err (!%p432_p1)
}
  0x22   :  { %39 = dma.hbm_to_vmem [thread:$0]  %s555_s2, 2048, %s34_s8, [#allocation7], %s465_s28, %s465_s28, %s466_s29  }
  0x23   :  { %458 = dma.done.wait [#allocation4], 256  }
  0x24   :  { %459 = vsyncadd [#allocation4], 4294967040 }
  0x25   :  { %460 = dma.done.wait [#allocation7], 2048  }
  0x26   :  { %461 = vsyncadd [#allocation7], 4294965248  ;;  %v52_v0 = vld [vmem:[#allocation6] sm:$0xff]  ;;  %v53_v1 = vld [vmem:[#allocation6 + $0x8] sm:$0xff]  ;;  %v176_v35 = vlaneseq  ;;  %v171_v38 = vstv %s557_s4  ;;  %vm186_vm0 = vcmask 1041409   ;;  %vm189_vm1 = vcmask 58368  }
  0x27   :  { %v54_v2 = vld [vmem:[#allocation6 + $0x10] sm:$0xff]  ;;  %v346_v3 = vpack.c.bf16 %v53_v1, %v52_v0  ;;  %v55_v4 = vld [vmem:[#allocation6 + $0x18] sm:$0xff]  ;;  %v56_v6 = vld [vmem:[#allocation6 + $0x20] sm:$0xff]  ;;  %v468_v48 = vmov 0  }
  0x28   :  { %v350_v5 = vpack.c.bf16 %v55_v4, %v54_v2  ;;  %v57_v7 = vld [vmem:[#allocation6 + $0x28] sm:$0xff]  ;;  %v50_v9 = vld [vmem:[#allocation3] sm:$0xff]  ;;  %v59_v11 = vld [vmem:[#allocation6 + $0x38] sm:$0xff]  ;;  %v177_v36 = vand.u32 127, %v176_v35  ;;  %v179_v37 = vshrl.u32 %v176_v35, 7  ;;  %385 = vset.pattern.permute.xlu0 %v468_v48  ;;  %384 = vset.pattern.permute.xlu1 %v468_v48 }
  0x29   :  { %347 = vmatprep.subr.bf16.mxu0 %v346_v3  ;;  %v354_v8 = vpack.c.bf16 %v57_v7, %v56_v6  ;;  %v58_v10 = vld [vmem:[#allocation6 + $0x30] sm:$0xff]  ;;  %343 = vmatprep.mubr.f32.mxu0 %v50_v9  ;;  %v60_v13 = vld [vmem:[#allocation6 + $0x40] sm:$0xff]  ;;  %v61_v14 = vld [vmem:[#allocation6 + $0x48] sm:$0xff] }
  0x2a   :  { %349 = vmatpush3.bf16.msra.mxu0 %v346_v3  ;;  %v358_v12 = vpack.c.bf16 %v59_v11, %v58_v10  ;;  %v362_v15 = vpack.c.bf16 %v61_v14, %v60_v13  ;;  %v62_v16 = vld [vmem:[#allocation6 + $0x50] sm:$0xff]  ;;  %v63_v17 = vld [vmem:[#allocation6 + $0x58] sm:$0xff]  ;;  %v64_v19 = vld [vmem:[#allocation6 + $0x60] sm:$0xff]  ;;  %v180_v40 = vsub.s32 %v177_v36, %v179_v37  ;;  %v196_v49 = vsub.s32 0, %v179_v37 }
  0x2b   :  { %351 = vmatprep.subr.bf16.mxu0 %v350_v5  ;;  %v366_v18 = vpack.c.bf16 %v63_v17, %v62_v16  ;;  %v65_v20 = vld [vmem:[#allocation6 + $0x68] sm:$0xff]  ;;  %v66_v22 = vld [vmem:[#allocation6 + $0x70] sm:$0xff]  ;;  %v67_v23 = vld [vmem:[#allocation6 + $0x78] sm:$0xff]  ;;  %v200_v50 = vsub.s32 1, %v179_v37 }
  0x2c   :  { %v370_v21 = vpack.c.bf16 %v65_v20, %v64_v19  ;;  %v374_v24 = vpack.c.bf16 %v67_v23, %v66_v22  ;;  %v51_v25 = vld [vmem:[#allocation3 + $0x8] sm:$0xff]  ;;  %v290_v26 = vld [vmem:[%s556_s3] ss:$0 sm:$0xff]  ;;  %v292_v33 = vld [vmem:[%s554_s1 + $0x1] ss:$0 sm:$0xff] }
  0x2d   :  { %v291_v29 = vld [vmem:[%s554_s1] ss:$0 sm:$0xff]  ;;  %s469_s1 = smov [#allocation8]  }
  0x2e   :  { %353 = vmatpush3.bf16.msra.mxu0 %v350_v5  ;;  %s280_s4 = sshll.u32 %s469_s1, 4  ;;  %s281_s4 = int_to_ptr.vmem [resolvable:$true] %s280_s4 }
  0x2f   :  { %355 = vmatprep.subr.bf16.mxu0 %v354_v8  ;;  %s436_s24 = scalar_lea.vmem %s281_s4, 32  ;;  %p441_p3 = scmp.lt.s32.totalorder %s281_s4, %s281_s4 }
  0x30   :  { %p437_p2 = scmp.ne.s32.totalorder %s281_s4, %s436_s24  ;;  %p442_p4 = scmp.lt.s32.totalorder %s436_s24, %s436_s24 }
  0x32   :  { %357 = vmatpush3.bf16.msra.mxu0 %v354_v8  ;;  %p443_p5 = por %p442_p4, %p441_p3 }
  0x33   :  { %359 = vmatprep.subr.bf16.mxu0 %v358_v12 }
  0x34   :  { %p444_p6 = pnand %p443_p5, %p437_p2 }
  0x36   :  { %361 = vmatpush3.bf16.msra.mxu0 %v358_v12 }
  0x37   :  { %363 = vmatprep.subr.bf16.mxu0 %v362_v15 }
  0x3a   :  { %365 = vmatpush3.bf16.msra.mxu0 %v362_v15 }
  0x3b   :  { %367 = vmatprep.subr.bf16.mxu0 %v366_v18 }
  0x3e   :  { %369 = vmatpush3.bf16.msra.mxu0 %v366_v18 }
  0x3f   :  { %371 = vmatprep.subr.bf16.mxu0 %v370_v21 }
  0x42   :  { %373 = vmatpush3.bf16.msra.mxu0 %v370_v21 }
  0x43   :  { %375 = vmatprep.subr.bf16.mxu0 %v374_v24 }
  0x46   :  { %377 = vmatpush3.bf16.msra.mxu0 %v374_v24 }
  0x49   :  { %344 = vmatmul.mubr.f32.vlgmr.msra.gmra.mrb[0].mxu0 %v51_v25 }
 0x11c   :  { %v345_v27 = vpop.f32.mrb[0].mxu0 }
 0x11d   :  { %v141_v28 = vpop.f32.mrb[1].mxu0  ;;  %v147_v31 = vadd.f32 %v345_v27, %v290_v26 }
 0x11e   :  { %v142_v30 = vadd.f32 %v290_v26, %v141_v28 }
 0x11f   :  { %v165_v34 = vmul.f32 %v292_v33, %v147_v31 }
 0x120   :  { %v164_v32 = vmul.f32 %v291_v29, %v142_v30 }
 0x122   :  { %166 = vadd.xlane.f32.xlu0 %v164_v32 }
 0x126   :  { %168 = vadd.xlane.f32.xlu0 %v165_v34 }
 0x1af   :  { %v167_v39 = vpop.xlane.xlu0 %166 }
 0x1b0   :  { %v172_v41 = vadd.f32 %v171_v38, %v167_v39 }
 0x1b2   :  { %v181_v44 = vrot.slane %v172_v41, %v180_v40 }
 0x1b3   :  { %v169_v42 = vpop.xlane.xlu0 %168 }
 0x1b4   :  { %v173_v43 = vadd.f32 %v171_v38, %v169_v42 }
 0x1b6   :  { %v185_v45 = vrot.slane %v173_v43, %v180_v40 }
 0x1b8   :  { %v187_v46 = vsel %vm186_vm0, %v185_v45, %v181_v44 }
 0x1b9   :  { %v190_v47 = vsel %vm189_vm1, %v187_v46, -inf }
 0x1ba   :  { %191 = vmax.xlane.f32.xlu1 %v190_v47 }
 0x247   :  { %v192_v51 = vpop.xlane.xlu1 %191 }
 0x248   :  { %v197_v52 = vrot.slane %v192_v51, %v196_v49  ;;  %v201_v53 = vrot.slane %v192_v51, %v200_v50 }
 0x24a   :  { %v204_v54 = vsub.f32 %v172_v41, %v197_v52  ;;  %v205_v55 = vsub.f32 %v173_v43, %v201_v53 }
 0x24c   :  { %v206_v56 = vmul.f32 1.442695, %v204_v54  ;;  %v208_v57 = vmul.f32 1.442695, %v205_v55 }
 0x24e   :  { %386 = vpow2.f32 %v206_v56 }
 0x24f   :  { %388 = vpow2.f32 %v208_v57 }
 0x258   :  { %v387_v58 = vpop.eup %386 }
 0x259   :  { %v389_v59 = vpop.eup %388  ;;  %213 = vperm.xlu1 %384, %v387_v58  }
 0x25a   :  { %216 = vperm.xlu0 %385, %v389_v59  }
 0x2d8   :  { %v214_v60 = vpop.permute.xlu1 %213 }
 0x2d9   :  { %v217_v61 = vpop.permute.xlu0 %216  ;;  %v221_v62 = vrot.slane %v214_v60, %v180_v40 }
 0x2da   :  { %v225_v63 = vrot.slane %v217_v61, %v180_v40 }
 0x2dc   :  { %v226_v0 = vsel %vm186_vm0, %v225_v63, %v221_v62 }
 0x2dd   :  { %v228_v1 = vsel %vm189_vm1, %v226_v0, 0.0 }
 0x2de   :  { %229 = vadd.xlane.f32.xlu1 %v228_v1 }
 0x36b   :  { %v230_v2 = vpop.xlane.xlu1 %229 }
 0x36c   :  { %390 = vrcp.f32 %v230_v2 }
 0x376   :  { %v391_v3 = vpop.eup %390 }
 0x377   :  { %v236_v4 = vrot.slane %v391_v3, %v196_v49  ;;  %v240_v6 = vrot.slane %v391_v3, %v200_v50 }
 0x379   :  { %v243_v5 = vmul.f32 %v387_v58, %v236_v4  ;;  %v244_v7 = vmul.f32 %v389_v59, %v240_v6 }
 0x37b   :  { %247 = vperm.xlu0 %385, %v243_v5  }
 0x37f   :  { %252 = vperm.xlu0 %385, %v244_v7  }
 0x3fa   :  { %v248_v8 = vpop.permute.xlu0 %247 }
 0x3fb   :  { %v255_v9 = vmul.f32 %v248_v8, %v142_v30 }
 0x3fd   :  { %v257_v10 = vrot.slane %v255_v9, 4 }
 0x3fe   :  { %v253_v11 = vpop.permute.xlu0 %252 }
 0x3ff   :  { %v258_v12 = vadd.f32 %v257_v10, %v255_v9  ;;  %v256_v13 = vmul.f32 %v253_v11, %v147_v31 }
 0x401   :  { %v259_v14 = vrot.slane %v258_v12, 2  ;;  %v263_v15 = vrot.slane %v256_v13, 4 }
 0x403   :  { %v260_v16 = vadd.f32 %v259_v14, %v258_v12  ;;  %v264_v17 = vadd.f32 %v263_v15, %v256_v13 }
 0x405   :  { %v265_v18 = vrot.slane %v264_v17, 2  ;;  %v261_v19 = vrot.slane %v260_v16, 1 }
 0x407   :  { %v266_v20 = vadd.f32 %v265_v18, %v264_v17  ;;  %v262_v22 = vadd.f32 %v261_v19, %v260_v16 }
 0x409   :  { %v267_v21 = vrot.slane %v266_v20, 1 }
 0x40b   :  { %v268_v23 = vadd.f32 %v267_v21, %v266_v20 }
 0x40d   :  { %v271_v24 = vsel %vm186_vm0, %v268_v23, %v262_v22 }
 0x40e   :  { %273 = vst [vmem:[#allocation8] sm:$0x3] %v271_v24 }
 0x40f   :  { %447 = shalt.err (!%p444_p6)
}
 0x410   :  { %s448_s27 = scalar_lea.hbm %s558_s5, 32 }
 0x411   :  { %p449_p7 = scmp.ne.s32.totalorder %s558_s5, %s448_s27  ;;  %p452_p8 = scmp.lt.u32.totalorder %s448_s27, %s558_s5 }
 0x413   :  { %p454_p9 = pnand %p452_p8, %p449_p7 }
 0x415   :  { %457 = shalt.err (!%p454_p9)
}
 0x416   :  { %283 = dma.vmem_to_hbm [thread:$0]  %s281_s4, 32, %s558_s5, [#allocation5]  }
 0x417   :  { %462 = dma.done.wait [#allocation5], 32  }
 0x418   :  { %463 = vsyncadd [#allocation5], 4294967264 }
 0x419   :  { %287 = vsyncpa [#allocation4], 1 }
 0x41a   :  { %288 = vsyncpa [#allocation7], 1 }
 0x41b   :  { %289 = vsyncpa [#allocation5], 1 }

</bundles_post_ra>
